<compile_context>
chip_gen: v6e
topology: v6e:2x2x1
jax: 0.10.0
libtpu: 0.0.40
codegen_flags: <defaults>
</compile_context>

<pallas_src>
import functools

import jax
import jax.numpy as jnp
from jax.experimental import pallas as pl
from jax.experimental.pallas import tpu as pltpu

_VMEM_LIMIT_FLOOR = 32 * 1024 * 1024     # safe on v5e/v6e/v7x
_VMEM_LIMIT_CEIL = 64 * 1024 * 1024      # v7x physical per-TC VMEM


# ---------------------------------------------------------------------------
# Fused single-pass kernel (per-batch slab fits in VMEM).
# ---------------------------------------------------------------------------
def _fused_kernel(w1_ref, b1_ref, w2_ref, b2_ref, x_ref, o_ref, *, inv_s):
    xf = x_ref[...].astype(jnp.float32)              # (1, C, S)

    avg_p = jnp.sum(xf, axis=-1) * inv_s             # (1, C) full-window avg pool
    max_p = jnp.max(xf, axis=-1)                     # (1, C) full-window max pool

    # Batch the two MLP branches into a single (2, C) @ (C, Ch) / (2, Ch) @ (Ch, C).
    pooled = jnp.concatenate([avg_p, max_p], axis=0)                       # (2, C)
    h = jnp.dot(pooled, w1_ref[...].astype(jnp.float32),
                preferred_element_type=jnp.float32) + b1_ref[...].astype(jnp.float32)
    h = jnp.maximum(h, 0.0)                                                # ReLU
    att = jnp.dot(h, w2_ref[...].astype(jnp.float32),
                  preferred_element_type=jnp.float32) + b2_ref[...].astype(jnp.float32)
    gate = jax.nn.sigmoid(att[0:1, :] + att[1:2, :])                       # (1, C)

    scale = gate[:, :, None]                         # (1, C, 1), once per batch
    o_ref[...] = (xf * scale).astype(o_ref.dtype)


# ---------------------------------------------------------------------------
# Phase 1: per-(batch, channel) running sum / max over the spatial axis.
# ---------------------------------------------------------------------------
def _reduce_kernel(x_ref, sum_ref, max_ref, *, s_total, tile_s, mask_last):
    s = pl.program_id(1)
    n_s = pl.num_programs(1)
    x = x_ref[...].astype(jnp.float32)               # (1, C, tile_s)

    def _accum(xs, xm, init):
        part_sum = jnp.sum(xs, axis=-1, keepdims=True)    # (1, C, 1) -> C on sublanes
        part_max = jnp.max(xm, axis=-1, keepdims=True)    # (1, C, 1)
        if init:
            sum_ref[...] = part_sum
            max_ref[...] = part_max
        else:
            sum_ref[...] = sum_ref[...] + part_sum
            max_ref[...] = jnp.maximum(max_ref[...], part_max)

    if mask_last:
        # mask_last implies n_s >= 2, so the last tile is never the init tile.
        @pl.when(s == 0)
        def _():
            _accum(x, x, init=True)

        @pl.when(jnp.logical_and(s > 0, s < n_s - 1))
        def _():
            _accum(x, x, init=False)

        @pl.when(s == n_s - 1)
        def _():
            lane = jax.lax.broadcasted_iota(jnp.int32, (1, 1, tile_s), 2) + s * tile_s
            valid = lane < s_total                                 # (1, 1, tile_s)
            _accum(jnp.where(valid, x, 0.0),
                   jnp.where(valid, x, -jnp.inf), init=False)
    else:
        @pl.when(s == 0)
        def _():
            _accum(x, x, init=True)

        @pl.when(s > 0)
        def _():
            _accum(x, x, init=False)


# ---------------------------------------------------------------------------
# Phase 2: streamed per-channel scale (pure element-wise; no in-kernel MLP).
# ---------------------------------------------------------------------------
def _scale_kernel(scale_ref, x_ref, o_ref):
    scale = scale_ref[...]                            # (1, C, 1) f32, C on sublanes
    o_ref[...] = (x_ref[...].astype(jnp.float32) * scale).astype(o_ref.dtype)


# ---------------------------------------------------------------------------
# Tile sizing (by bytes, not lane count).
# ---------------------------------------------------------------------------
def _pick_tile_s(S, C, itemsize, target_bytes):
    if S * C * itemsize <= target_bytes or S <= 128:
        return S
    tile = max(128, (target_bytes // (C * itemsize)) // 128 * 128)
    if tile >= S:
        tile = S
    return tile


def _vmem_limit(block_bytes):
    need = 4 * block_bytes + 4 * 1024 * 1024          # 2 buffers x (in + out) + slack
    return int(min(_VMEM_LIMIT_CEIL, max(_VMEM_LIMIT_FLOOR, need)))


# ---------------------------------------------------------------------------
# Wrapper
# ---------------------------------------------------------------------------
def channel_gate_bk(x, w1, b1, w2, b2, *,
                    tile_target_bytes=2 * 1024 * 1024,
                    fused_threshold_bytes=4 * 1024 * 1024):
    """x: (B, C, D, H, W). Weights stored (in, out) so the MLP is p @ W + b."""
    B, C, D, H, W = x.shape
    S = D * H * W
    Ch = w1.shape[1]
    itemsize = jnp.dtype(x.dtype).itemsize
    xf = x.reshape(B, C, S)                           # native dtype; no HBM upcast
    b1r = b1.reshape(1, Ch)
    b2r = b2.reshape(1, C)

    slab_bytes = C * S * itemsize

    # -------------------- fused single-pass path -------------------------
    if slab_bytes <= fused_threshold_bytes:
        out = pl.pallas_call(
            functools.partial(_fused_kernel, inv_s=1.0 / S),
            grid=(B,),
            in_specs=[
                pl.BlockSpec((C, Ch), lambda b: (0, 0)),        # w1 (resident)
                pl.BlockSpec((1, Ch), lambda b: (0, 0)),        # b1
                pl.BlockSpec((Ch, C), lambda b: (0, 0)),        # w2
                pl.BlockSpec((1, C), lambda b: (0, 0)),         # b2
                pl.BlockSpec((1, C, S), lambda b: (b, 0, 0)),   # x slab
            ],
            out_specs=pl.BlockSpec((1, C, S), lambda b: (b, 0, 0)),
            out_shape=jax.ShapeDtypeStruct((B, C, S), x.dtype),
            compiler_params=pltpu.CompilerParams(
                dimension_semantics=("parallel",),
                vmem_limit_bytes=_vmem_limit(slab_bytes)),
            cost_estimate=pl.CostEstimate(
                flops=3 * B * C * S + 4 * B * C * Ch,
                transcendentals=B * C,
                bytes_accessed=2 * B * C * S * itemsize),
        )(w1, b1r, w2, b2r, xf)
        return out.reshape(B, C, D, H, W)

    # -------------------- two-phase streamed path -------------------------
    tile_s = _pick_tile_s(S, C, itemsize, tile_target_bytes)
    n_s = pl.cdiv(S, tile_s)
    mask_last = (S % tile_s) != 0
    tile_bytes = C * tile_s * itemsize

    # ---- phase 1: pooled sum / max (C kept on sublanes) ------------------
    sum_pool, max_pool = pl.pallas_call(
        functools.partial(_reduce_kernel, s_total=S, tile_s=tile_s,
                          mask_last=mask_last),
        grid=(B, n_s),
        in_specs=[pl.BlockSpec((1, C, tile_s), lambda b, s: (b, 0, s))],
        out_specs=[
            pl.BlockSpec((1, C, 1), lambda b, s: (b, 0, 0)),
            pl.BlockSpec((1, C, 1), lambda b, s: (b, 0, 0)),
        ],
        out_shape=[
            jax.ShapeDtypeStruct((B, C, 1), jnp.float32),
            jax.ShapeDtypeStruct((B, C, 1), jnp.float32),
        ],
        compiler_params=pltpu.CompilerParams(
            dimension_semantics=("parallel", "arbitrary"),
            vmem_limit_bytes=_vmem_limit(tile_bytes)),
        cost_estimate=pl.CostEstimate(
            flops=2 * B * C * S,
            transcendentals=0,
            bytes_accessed=B * C * S * itemsize + 2 * B * C * 4),
    )(xf)

    # ---- gate: tiny MLP + sigmoid in plain JAX (B x C work) ---------------
    avg_p = sum_pool[:, :, 0] * (1.0 / S)             # (B, C)
    max_p = max_pool[:, :, 0]                         # (B, C)

    def mlp(p):
        h = jnp.maximum(
            p @ w1.astype(jnp.float32) + b1.astype(jnp.float32), 0.0)
        return h @ w2.astype(jnp.float32) + b2.astype(jnp.float32)

    scale = jax.nn.sigmoid(mlp(avg_p) + mlp(max_p)).astype(jnp.float32)
    scale = scale.reshape(B, C, 1)                    # C on sublanes, matches x tiles

    # ---- phase 2: streamed element-wise per-channel scale -----------------
    out = pl.pallas_call(
        _scale_kernel,
        grid=(B, n_s),
        in_specs=[
            pl.BlockSpec((1, C, 1), lambda b, s: (b, 0, 0)),        # scale
            pl.BlockSpec((1, C, tile_s), lambda b, s: (b, 0, s)),   # x tile
        ],
        out_specs=pl.BlockSpec((1, C, tile_s), lambda b, s: (b, 0, s)),
        out_shape=jax.ShapeDtypeStruct((B, C, S), x.dtype),
        compiler_params=pltpu.CompilerParams(
            dimension_semantics=("parallel", "parallel"),
            vmem_limit_bytes=_vmem_limit(tile_bytes)),
        cost_estimate=pl.CostEstimate(
            flops=B * C * S,
            transcendentals=0,
            bytes_accessed=2 * B * C * S * itemsize),
    )(scale, xf)

    return out.reshape(B, C, D, H, W)


# ---------------------------------------------------------------------------
# Pure-JAX reference for sanity checking.
# ---------------------------------------------------------------------------
def reference(x, w1, b1, w2, b2):
    B, C = x.shape[0], x.shape[1]
    xf = x.reshape(B, C, -1).astype(jnp.float32)
    avg_p = jnp.mean(xf, axis=-1)
    max_p = jnp.max(xf, axis=-1)

    def mlp(p):
        return jnp.maximum(p @ w1 + b1, 0.0) @ w2 + b2

    scale = jax.nn.sigmoid(mlp(avg_p) + mlp(max_p))
    return (x.astype(jnp.float32) * scale[:, :, None, None, None]).astype(x.dtype)


if __name__ == "__main__":
    reduction_ratio = 2
    key = jax.random.PRNGKey(0)
    kx, k1, k2, k3, k4, ky = jax.random.split(key, 6)

    B, C = 2, 8
    Ch = C // reduction_ratio

    # nn.Linear(C, Ch), nn.Linear(Ch, C) stored as (in, out) so p @ W + b.
    w1 = jax.random.normal(k1, (C, Ch), dtype=jnp.float32) * 0.2
    b1 = jax.random.normal(k2, (Ch,), dtype=jnp.float32) * 0.1
    w2 = jax.random.normal(k3, (Ch, C), dtype=jnp.float32) * 0.2
    b2 = jax.random.normal(k4, (C,), dtype=jnp.float32) * 0.1

    def check(x, **kw):
        out = jax.block_until_ready(channel_gate_bk(x, w1, b1, w2, b2, **kw))
        ref = jax.block_until_ready(reference(x, w1, b1, w2, b2))
        assert out.shape == x.shape
        assert jnp.allclose(out, ref, atol=1e-5, rtol=1e-5), "mismatch vs JAX reference"

    # 1) fused single-pass path (default dispatch at these shapes).
    x_a = jax.random.normal(kx, (B, C, 4, 8, 8), dtype=jnp.float32)
    check(x_a)

    # 2) two-phase streamed path, evenly divisible spatial tiles.
    check(x_a, fused_threshold_bytes=0, tile_target_bytes=1)

    # 3) two-phase streamed path with a masked partial last tile (S = 210).
    x_b = jax.random.normal(ky, (B, C, 3, 7, 10), dtype=jnp.float32)
    check(x_b, fused_threshold_bytes=0, tile_target_bytes=1)

    print("KERNEL_OK")
</pallas_src>

<mosaic_0001>
module attributes {stable_mosaic.version = 11 : i64} {
  func.func @_fused_kernel(%arg0: i32, %arg1: memref<8x4xf32, #tpu.memory_space<vmem>>, %arg2: memref<1x4xf32, #tpu.memory_space<vmem>>, %arg3: memref<4x8xf32, #tpu.memory_space<vmem>>, %arg4: memref<1x8xf32, #tpu.memory_space<vmem>>, %arg5: memref<1x8x256xf32, #tpu.memory_space<vmem>>, %arg6: memref<1x8x256xf32, #tpu.memory_space<vmem>>) attributes {dimension_semantics = [#tpu.dimension_semantics<parallel>], iteration_bounds = array<i64: 2>, scalar_prefetch = 0 : i64, scratch_operands = 0 : i64, tpu.core_type = #tpu.core_type<tc>, window_params = [{pipeline_mode = #tpu.pipeline_mode<synchronous>, transform_indices = @transform_0, window_bounds = array<i64: 8, 4>}, {pipeline_mode = #tpu.pipeline_mode<synchronous>, transform_indices = @transform_1, window_bounds = array<i64: 1, 4>}, {pipeline_mode = #tpu.pipeline_mode<synchronous>, transform_indices = @transform_2, window_bounds = array<i64: 4, 8>}, {pipeline_mode = #tpu.pipeline_mode<synchronous>, transform_indices = @transform_3, window_bounds = array<i64: 1, 8>}, {transform_indices = @transform_4, window_bounds = array<i64: 1, 8, 256>}, {transform_indices = @transform_5, window_bounds = array<i64: 1, 8, 256>}]} {
    %c0 = arith.constant 0 : index
    %c0_0 = arith.constant 0 : index
    %c0_1 = arith.constant 0 : index
    %0 = vector.load %arg5[%c0, %c0_0, %c0_1] : memref<1x8x256xf32, #tpu.memory_space<vmem>>, vector<1x8x256xf32>
    %cst = arith.constant dense<0.000000e+00> : vector<1x8xf32>
    %1 = vector.multi_reduction <add>, %0, %cst [2] : vector<1x8x256xf32> to vector<1x8xf32>
    %cst_2 = arith.constant 3.906250e-03 : f32
    %2 = vector.broadcast %cst_2 : f32 to vector<1x8xf32>
    %3 = arith.mulf %1, %2 : vector<1x8xf32>
    %cst_3 = arith.constant dense<0xFF800000> : vector<1x8xf32>
    %4 = vector.multi_reduction <maximumf>, %0, %cst_3 [2] : vector<1x8x256xf32> to vector<1x8xf32>
    %5 = tpu.concatenate %3, %4 in 0 : vector<1x8xf32>, vector<1x8xf32> -> vector<2x8xf32>
    %c0_4 = arith.constant 0 : index
    %c0_5 = arith.constant 0 : index
    %6 = vector.load %arg1[%c0_4, %c0_5] : memref<8x4xf32, #tpu.memory_space<vmem>>, vector<8x4xf32>
    %cst_6 = arith.constant dense<0.000000e+00> : vector<2x4xf32>
    %7 = tpu.matmul %5, %6, %cst_6 {dimension_numbers = #tpu.dot_dimension_numbers<[1], [0], [0], [1], [0, 0, 1, 1], [], []>} : vector<2x8xf32>, vector<8x4xf32>, vector<2x4xf32> -> vector<2x4xf32>
    %c0_7 = arith.constant 0 : index
    %c0_8 = arith.constant 0 : index
    %8 = vector.load %arg2[%c0_7, %c0_8] : memref<1x4xf32, #tpu.memory_space<vmem>>, vector<1x4xf32>
    %9 = vector.broadcast %8 : vector<1x4xf32> to vector<2x4xf32>
    %10 = arith.addf %7, %9 : vector<2x4xf32>
    %cst_9 = arith.constant 0.000000e+00 : f32
    %11 = vector.broadcast %cst_9 : f32 to vector<2x4xf32>
    %12 = arith.maximumf %10, %11 : vector<2x4xf32>
    %c0_10 = arith.constant 0 : index
    %c0_11 = arith.constant 0 : index
    %13 = vector.load %arg3[%c0_10, %c0_11] : memref<4x8xf32, #tpu.memory_space<vmem>>, vector<4x8xf32>
    %cst_12 = arith.constant dense<0.000000e+00> : vector<2x8xf32>
    %14 = tpu.matmul %12, %13, %cst_12 {dimension_numbers = #tpu.dot_dimension_numbers<[1], [0], [0], [1], [0, 0, 1, 1], [], []>} : vector<2x4xf32>, vector<4x8xf32>, vector<2x8xf32> -> vector<2x8xf32>
    %c0_13 = arith.constant 0 : index
    %c0_14 = arith.constant 0 : index
    %15 = vector.load %arg4[%c0_13, %c0_14] : memref<1x8xf32, #tpu.memory_space<vmem>>, vector<1x8xf32>
    %16 = vector.broadcast %15 : vector<1x8xf32> to vector<2x8xf32>
    %17 = arith.addf %14, %16 : vector<2x8xf32>
    %18 = vector.extract_strided_slice %17 {offsets = [0, 0], sizes = [1, 8], strides = [1, 1]} : vector<2x8xf32> to vector<1x8xf32>
    %19 = vector.extract_strided_slice %17 {offsets = [1, 0], sizes = [1, 8], strides = [1, 1]} : vector<2x8xf32> to vector<1x8xf32>
    %20 = arith.addf %18, %19 : vector<1x8xf32>
    %21 = arith.negf %20 : vector<1x8xf32>
    %22 = math.exp %21 : vector<1x8xf32>
    %cst_15 = arith.constant 1.000000e+00 : f32
    %23 = vector.broadcast %cst_15 : f32 to vector<1x8xf32>
    %24 = arith.addf %23, %22 : vector<1x8xf32>
    %25 = arith.divf %23, %24 : vector<1x8xf32>
    %26 = vector.shape_cast %25 : vector<1x8xf32> to vector<1x8x1xf32>
    %27 = vector.broadcast %26 : vector<1x8x1xf32> to vector<1x8x256xf32>
    %28 = arith.mulf %0, %27 : vector<1x8x256xf32>
    %c0_16 = arith.constant 0 : index
    %c0_17 = arith.constant 0 : index
    %c0_18 = arith.constant 0 : index
    %29 = vector.load %arg6[%c0_16, %c0_17, %c0_18] : memref<1x8x256xf32, #tpu.memory_space<vmem>>, vector<1x8x256xf32>
    tpu.vector_store %arg6[%c0_16, %c0_17, %c0_18], %28 {strides = array<i32>} : memref<1x8x256xf32, #tpu.memory_space<vmem>>, vector<1x8x256xf32>,
    return
  }
  func.func @transform_0(%arg0: i32) -> (i32, i32) {
    %c0_i32 = arith.constant 0 : i32
    %c0_i32_0 = arith.constant 0 : i32
    %c0_i32_1 = arith.constant 0 : i32
    return %c0_i32, %c0_i32_0 : i32, i32
  }
  func.func @transform_1(%arg0: i32) -> (i32, i32) {
    %c0_i32 = arith.constant 0 : i32
    %c0_i32_0 = arith.constant 0 : i32
    %c0_i32_1 = arith.constant 0 : i32
    return %c0_i32, %c0_i32_0 : i32, i32
  }
  func.func @transform_2(%arg0: i32) -> (i32, i32) {
    %c0_i32 = arith.constant 0 : i32
    %c0_i32_0 = arith.constant 0 : i32
    %c0_i32_1 = arith.constant 0 : i32
    return %c0_i32, %c0_i32_0 : i32, i32
  }
  func.func @transform_3(%arg0: i32) -> (i32, i32) {
    %c0_i32 = arith.constant 0 : i32
    %c0_i32_0 = arith.constant 0 : i32
    %c0_i32_1 = arith.constant 0 : i32
    return %c0_i32, %c0_i32_0 : i32, i32
  }
  func.func @transform_4(%arg0: i32) -> (i32, i32, i32) {
    %c0_i32 = arith.constant 0 : i32
    %c0_i32_0 = arith.constant 0 : i32
    %c0_i32_1 = arith.constant 0 : i32
    return %arg0, %c0_i32, %c0_i32_0 : i32, i32, i32
  }
  func.func @transform_5(%arg0: i32) -> (i32, i32, i32) {
    %c0_i32 = arith.constant 0 : i32
    %c0_i32_0 = arith.constant 0 : i32
    %c0_i32_1 = arith.constant 0 : i32
    return %arg0, %c0_i32, %c0_i32_0 : i32, i32, i32
  }
}

</mosaic_0001>

<bundles_post_ra>
// kernel: tpu_custom_call.1
= control target key start
LH: loop header
LB: loop body
LE: loop exit
PB: predicated region body
PF: predicated region fallthrough
CT: control target
= control target key end

     0   :  { %10 = vsyncpa [#allocation3], 0  ;;  %s920_s0 = inlined_call_operand.vmem [shape: f32[8,4], index: 0, kind: input, shape index: {}]   ;;  %s921_s1 = inlined_call_operand.vmem [shape: f32[1,4], index: 1, kind: input, shape index: {}]   ;;  %s922_s2 = inlined_call_operand.vmem [shape: f32[4,8], index: 2, kind: input, shape index: {}]   ;;  %s923_s3 = inlined_call_operand.vmem [shape: f32[1,8], index: 3, kind: input, shape index: {}]   ;;  %s924_s4 = inlined_call_operand.hbm [shape: f32[2,8,256], index: 4, kind: input, shape index: {}]   ;;  %s925_s5 = inlined_call_operand.hbm [shape: f32[2,8,256], index: 5, kind: output, shape index: {}]  }
   0x1   :  { %12 = vsyncpa [#allocation3 + $0x1], 0 }
   0x2   :  { %13 = vsyncpa [#allocation4], 0 }
   0x3   :  { %15 = vsyncpa [#allocation4 + $0x1], 0  ;;  %s757_s18 = smov 0   ;;  %s759_s19 = smov 0  }
   0x4   :  { %s761_s20 = smov 0   ;;  %s763_s21 = smov 0  }
   0x5 LB: > { %s778_s22 = sadd.s32 4294967295, %s721_s21   ;;  %s541_s23 = sadd.s32 4294967294, %s721_s21   ;;  %s721_s21 = sphi %s763_s21, %s942_s21   ;;  %s717_s20 = sphi %s761_s20, %s941_s20   ;;  %s713_s19 = sphi %s759_s19, %s940_s19   ;;  %s709_s18 = sphi %s757_s18, %s939_s18  }
   0x6   : > { %s782_s24 = sadd.s32 1, %s721_s21   ;;  %s112_s25 = sadd.s32 1, %s717_s20 }
   0x7   : > { %s109_s26 = ssub.s32 %s721_s21, %s782_s24  ;;  %p119_p0 = scmp.ne.s32.totalorder %s717_s20, %s713_s19 }
   0x8   : > { %p110_p1 = scmp.eq.s32.totalorder %s109_s26, 0  ;;  %p120_p2 = scmp.eq.s32.totalorder %s721_s21, 0 }
   0x9   : > { %p125_p3 = scmp.ne.s32.totalorder %s713_s19, %s709_s18  ;;  %p126_p4 = scmp.eq.s32.totalorder %s778_s22, 0 }
   0xa   : > { %s794_s27 = scalar_select %p110_p1, %s717_s20, %s112_s25  }
   0xb   : > { %p796_p5 = por %p120_p2, %p119_p0  ;;  %p800_p6 = por %p126_p4, %p125_p3 }
   0xc   : > { %p149_p7 = scmp.eq.s32.totalorder %s778_s22, 1  ;;  %p155_p8 = scmp.eq.s32.totalorder %s541_s23, 1 }
   0xd   : > { %s929_s29 = scalar_select %p800_p6, 1, 0 }
   0xe   : > { %p589_p10 = scmp.lt.s32.totalorder %s721_s21, 2  ;;  %p807_p11 = por %p149_p7, %p119_p0 }
   0xf   : > { %p811_p12 = por %p155_p8, %p125_p3  ;;  %s187_s7 = sand.u32 1, %s717_s20  }
  0x10   : > { %s930_s30 = scalar_select %p807_p11, 1, 0 }
  0x11   : > { %s931_s6 = scalar_select %p811_p12, 1, 0 }
  0x12   : > { %s561_s8 = sshll.u32 %s721_s21, 8  ;;  %s544_s9 = sshll.u32 %s187_s7, 4 }
  0x13   : > { %s820_s12 = scalar_lea.hbm %s924_s4, %s561_s8  ;;  %s191_s13 = scalar_lea.vmem [#allocation2], %s544_s9 }
  0x14   : > { %s199_s14 = sshll.u32 %s191_s13, 4  ;;  %p824_p13 = pnand %p589_p10, %p796_p5  ;;  %s828_s14 = int_to_ptr.vmem [resolvable:$true] %s199_s14 }
  0x15   : > { %s188_s16 = scalar_lea.sflag [#allocation3], %s187_s7  ;;  %s629_s17 = scalar_lea.hbm %s820_s12, 256 }
  0x16   : > { %p630_p2 = scmp.ne.s32.totalorder %s820_s12, %s629_s17  ;;  %p631_p3 = pneg %p824_p13 }
  0x17   : > { %s634_s26 = scalar_lea.hbm %s924_s4, 512  ;;  %p635_p5 = scmp.lt.s32.totalorder %s820_s12, %s924_s4 }
  0x18   : > { %p632_p4 = pnand %p631_p3, %p630_p2  ;;  %p636_p8 = scmp.lt.s32.totalorder %s634_s26, %s629_s17 }
  0x1a   : > { %p633_p7 = pneg %p632_p4  ;;  %p637_p10 = por %p636_p8, %p635_p5 }
  0x1c   : > { %p638_p9 = pnand %p637_p10, %p633_p7 }
  0x1e   : > { %641 = shalt.err (!%p638_p9)
}
  0x1f   : > { %s642_s7 = scalar_lea.vmem %s828_s14, 256  ;;  %s723_s9 = smov [#allocation2]  }
  0x20   : > { %p643_p0 = scmp.ne.s32.totalorder %s828_s14, %s642_s7  ;;  %s647_s10 = sshll.u32 %s723_s9, 4  ;;  %s648_s10 = int_to_ptr.vmem [resolvable:$false] %s647_s10 }
  0x21   : > { %s649_s11 = scalar_lea.vmem %s648_s10, 512  ;;  %p650_p4 = scmp.lt.s32.totalorder %s828_s14, %s648_s10 }
  0x22   : > { %p645_p1 = pnand %p643_p0, %p631_p3  ;;  %p651_p12 = scmp.lt.s32.totalorder %s649_s11, %s642_s7 }
  0x24   : > { %p646_p2 = pneg %p645_p1  ;;  %p652_p11 = por %p651_p12, %p650_p4 }
  0x26   : > { %p653_p6 = pnand %p652_p11, %p646_p2 }
  0x28   : > { %656 = shalt.err (!%p653_p6)
}
  0x29   : > { %584 = dma.hbm_to_vmem [thread:$0]  (!%p824_p13), %s820_s12, 256, %s828_s14, %s188_s16  }
  0x2a   : > { %p933_p9 = scmp.lt.s32.totalorder %s721_s21, 3  ;;  %p934_p7 = scmp.ge.s32.totalorder %s721_s21, 1 }
  0x2c   : > { %p205_p0 = pnand %p934_p7, %p933_p9 }
  0x2d   : > { %s855_s13 = sand.u32 (!%p205_p0), 1, %s713_s19   ;;  %p935_p6 = scmp.ne.s32.totalorder (!%p205_p0), %s929_s29, 0 }
  0x2e   : > { %208 = sbr.rel (%p205_p0) target bundleno = 760 (0x2f8), region = 40  ;;  %s548_s17 = sshll.u32 (!%p205_p0), %s855_s13, 4 }
  0x2f   : > { %s211_s23 = scalar_lea.sflag (!%p205_p0), [#allocation3], %s855_s13  ;;  %s214_s15 = scalar_lea.vmem (!%p205_p0), [#allocation2], %s548_s17 }
  0x33   : > { %700 = dma.done.wait (%p935_p6), %s211_s23, 256  }
  0x34   : > { %702 = vsyncadd (%p935_p6), %s211_s23, 4294967040  ;;  %v241_v0 = vld [vmem:[%s214_s15] sm:$0xff]  ;;  %v242_v1 = vld [vmem:[%s214_s15 + $0x8] sm:$0xff]  ;;  %v724_v5 = vmov 0.0   ;;  %vm725_vm0 = vmmov 0   ;;  %v251_v6 = vlaneseq  ;;  %vm264_vm1 = vcmask 1040384  }
  0x35   : > { %v243_v2 = vadd.f32 %v242_v1, %v241_v0  ;;  %v247_v3 = vmax.f32 %v241_v0, %v242_v1  ;;  %v266_v4 = vld [vmem:[%s920_s0] sm:$0xff]  ;;  %567 = vmatprep.subr.mxu0 %v724_v5  ;;  %569 = vmatprep.mubr.msk.f32.mxu0 %vm725_vm0, %v724_v5  ;;  %vm274_vm2 = vcmask 64512   ;;  %vm361_vm3 = vcmask 1043456   ;;  %s562_s7 = sshll.u32 %s778_s22, 8  ;;  %s240_s9 = scalar_lea.vmem [#allocation5], %s548_s17 }
  0x36   : > { %568 = vmatpush3.msra.mxu0 %v266_v4  ;;  %572 = vmatprep.subr.mxu1 %v724_v5  ;;  %v252_v7 = vand.u32 127, %v251_v6  ;;  %v254_v8 = vshrl.u32 %v251_v6, 7  ;;  %v349_v16 = vld [vmem:[%s922_s2] sm:$0xf]  ;;  %vm357_vm4 = vcmask 31744   ;;  %s471_s10 = sshll.u32 %s240_s9, 4  ;;  %s883_s15 = scalar_lea.hbm %s925_s5, %s562_s7  ;;  %s472_s10 = int_to_ptr.vmem [resolvable:$true] %s471_s10 }
  0x37   : > { %244 = vadd.xlane.f32.xlu0 %v243_v2  ;;  %574 = vmatprep.mubr.msk.f32.mxu1 %vm725_vm0, %v724_v5  ;;  %v550_v17 = vld [vmem:[%s921_s1] ss:$0 sm:$0xff]  ;;  %s457_s12 = scalar_lea.sflag [#allocation4], %s855_s13  ;;  %s657_s14 = scalar_lea.vmem %s472_s10, 256 }
  0x38   : > { %v255_v10 = vsub.s32 %v252_v7, %v254_v8  ;;  %573 = vmatpush3.msk.msra.mxu1 %vm361_vm3, %v349_v16  ;;  %v552_v22 = vld [vmem:[%s923_s3] ss:$0 sm:$0xff]  ;;  %v447_v31 = vsub.s32 0, %v254_v8  ;;  %p658_p11 = scmp.ne.s32.totalorder %s472_s10, %s657_s14  ;;  %p936_p12 = scmp.ne.s32.totalorder %s930_s30, 0 }
  0x39   : > { %s726_s22 = smov [#allocation5]  }
  0x3a   : > { %p659_p13 = pnand %p658_p11, %p936_p12  ;;  %s661_s17 = sshll.u32 %s726_s22, 4  ;;  %s662_s17 = int_to_ptr.vmem [resolvable:$false] %s661_s17 }
  0x3b   : > { %248 = vmax.xlane.f32.xlu0 %v247_v3  ;;  %s663_s29 = scalar_lea.vmem %s662_s17, 512  ;;  %p664_p3 = scmp.lt.s32.totalorder %s472_s10, %s662_s17 }
  0x3c   : > { %p660_p1 = pneg %p659_p13  ;;  %p665_p5 = scmp.lt.s32.totalorder %s663_s29, %s657_s14 }
  0x3e   : > { %p666_p8 = por %p665_p5, %p664_p3 }
  0x40   : > { %p667_p10 = pnand %p666_p8, %p660_p1 }
  0xc0   : > { %v245_v9 = vpop.xlane.xlu0 %244 }
  0xc1   : > { %v246_v11 = vmul.f32 0.00390625, %v245_v9 }
  0xc3   : > { %v256_v13 = vrot.slane %v246_v11, %v255_v10 }
  0xc4   : > { %v249_v12 = vpop.xlane.xlu0 %248 }
  0xc5   : > { %v262_v14 = vrot.slane %v249_v12, %v255_v10 }
  0xc7   : > { %v265_v15 = vsel %vm264_vm1, %v256_v13, %v262_v14 }
  0xc8   : > { %570 = vmatmul.mubr.msk.f32.vlgmr.msra.gmra.mxu0 %vm274_vm2, %v265_v15 }
 0x188   : > { %v344_v18 = vpop.f32.mrf.mxu0 }
 0x189   : > { %v345_v19 = vadd.f32 %v550_v17, %v344_v18 }
 0x18a   : > { %v571_v20 = vpop.f32.mrf.mxu0 }
 0x18b   : > { %v348_v21 = vmax.f32 %v345_v19, 0.0 }
 0x18d   : > { %575 = vmatmul.mubr.msk.f32.vlgmr.msra.gmra.mxu1 %vm357_vm4, %v348_v21 }
 0x24d   : > { %v431_v23 = vpop.f32.mrf.mxu1 }
 0x24e   : > { %v432_v24 = vadd.f32 %v552_v22, %v431_v23 }
 0x24f   : > { %v576_v25 = vpop.f32.mrf.mxu1 }
 0x250   : > { %v436_v26 = vrot.slane %v432_v24, 1 }
 0x252   : > { %v438_v27 = vadd.f32 %v436_v26, %v432_v24 }
 0x254   : > { %v555_v28 = vmul.f32 -1.442695, %v438_v27 }
 0x256   : > { %625 = vpow2.f32 %v555_v28 }
 0x263   : > { %v626_v29 = vpop.eup %625 }
 0x264   : > { %v442_v30 = vadd.f32 1.0, %v626_v29 }
 0x266   : > { %627 = vrcp.f32 %v442_v30 }
 0x273   : > { %v628_v32 = vpop.eup %627 }
 0x274   : > { %v448_v33 = vrot.slane %v628_v32, %v447_v31 }
 0x276   : > { %450 = vbcast.lane.b32.xlu1 %v448_v33, 256 }
 0x2e8   : > { %v451_v34 = vpop.permute.xlu1 %450 }
 0x2e9   : > { %v452_v35 = vmul.f32 %v451_v34, %v241_v0  ;;  %v453_v36 = vmul.f32 %v451_v34, %v242_v1 }
 0x2eb   : > { %454 = vst [vmem:[%s240_s9] sm:$0xff] %v452_v35  ;;  %455 = vst [vmem:[%s240_s9 + $0x8] sm:$0xff] %v453_v36 }
 0x2ec   : > { %670 = shalt.err (!%p667_p10)
}
 0x2ed   : > { %s671_s16 = scalar_lea.hbm %s883_s15, 256  ;;  %s675_s26 = scalar_lea.hbm %s925_s5, 512 }
 0x2ee   : > { %p672_p2 = scmp.ne.s32.totalorder %s883_s15, %s671_s16  ;;  %p676_p7 = scmp.lt.s32.totalorder %s883_s15, %s925_s5 }
 0x2ef   : > { %p677_p0 = scmp.lt.s32.totalorder %s675_s26, %s671_s16 }
 0x2f0   : > { %p673_p4 = pnand %p672_p2, %p936_p12 }
 0x2f1   : > { %p678_p6 = por %p677_p0, %p676_p7 }
 0x2f2   : > { %p674_p9 = pneg %p673_p4 }
 0x2f4   : > { %p679_p11 = pnand %p678_p6, %p674_p9 }
 0x2f6   : > { %682 = shalt.err (!%p679_p11)
}
 0x2f7   : > { %579 = dma.vmem_to_hbm [thread:$0]  (%p936_p12), %s472_s10, 256, %s883_s15, %s457_s12  }
 0x2f8 PF: > { %s483_s7 = sand.u32 1, %s709_s18   ;;  %p937_p13 = scmp.ne.s32.totalorder %s931_s6, 0 }
 0x2f9   : > { %p938_p1 = scmp.ge.s32.totalorder %s721_s21, 2  ;;  %s484_s9 = scalar_lea.sflag [#allocation4], %s483_s7 }
 0x2fb   : > { %p586_p3 = pnand %p938_p1, %p937_p13 }
 0x2fd   : > { %p587_p5 = pneg %p586_p3 }
 0x2ff   : > { %704 = dma.done.wait (%p587_p5), %s484_s9, 256  }
 0x300   : > { %706 = vsyncadd (%p587_p5), %s484_s9, 4294967040  ;;  %p18_p8 = scmp.ge.s32.totalorder %s782_s24, 4   ;;  %s939_s18 = smov %s713_s19 }
 0x301   : > { %s940_s19 = smov %s717_s20  ;;  %s941_s20 = smov %s794_s27 }
 0x302   : > { %s942_s21 = smov %s782_s24  ;;  %20 = sbr.rel (!%p18_p8) target bundleno = 5 (0x5), region = 85 }
 0x307   :  { %489 = vsyncpa [#allocation3], 1 }
 0x308   :  { %491 = vsyncpa [#allocation3 + $0x1], 1 }
 0x309   :  { %492 = vsyncpa [#allocation4], 1 }
 0x30a   :  { %494 = vsyncpa [#allocation4 + $0x1], 1 }

</bundles_post_ra>
